<compile_context>
chip_gen: v5e
topology: v5e:2x2
jax: 0.10.0
libtpu: 0.0.40
codegen_flags: <defaults>
</compile_context>

<pallas_src>
import jax
import jax.numpy as jnp
from jax.experimental import pallas as pl
from jax.experimental.pallas import tpu as pltpu

EPS = 1e-5  # PyTorch GroupNorm default eps


def _make_kernel(H, W, C, groups, use_bias, use_agg):
    HW = H * W
    cg = C // groups
    inv_cnt = 1.0 / float(HW * cg)                       # multiply, never divide
    OFF = [(kh - 1, kw - 1) for kh in range(3) for kw in range(3)]

    def kernel(*refs):
        it = iter(refs)
        x_ref = next(it)
        w1_ref = next(it)
        b1_ref = next(it) if use_bias else None
        g1_ref, be1_ref = next(it), next(it)
        w2_ref = next(it)
        b2_ref = next(it) if use_bias else None
        g2_ref, be2_ref = next(it), next(it)
        agg_ref = next(it) if use_agg else None
        mask_ref = next(it)
        o_ref = next(it)

        x = x_ref[0]                                     # (C, HW) f32, lane-dense
        masks = mask_ref[...]                            # (9, HW) f32, hoisted

        def conv3x3(a, w_ref, b_ref):
            # Nine accumulated (C, C) @ (C, HW) MXU dots: never materializes the
            # (9C, HW) im2col slab and needs no concatenate store pass.  Taps
            # are produced by an XLU lane rotation plus a host-precomputed
            # boundary mask (equivalent to SAME zero-padding); they are cast to
            # the weight dtype (bf16 by default) only at the MXU input, with
            # f32 accumulation via preferred_element_type.
            acc = None
            for k, (dh, dw) in enumerate(OFF):
                if dh == 0 and dw == 0:
                    tap = a
                else:
                    shift = (-(dh * W + dw)) % HW
                    tap = pltpu.roll(a, shift=shift, axis=1)   # XLU rotate
                    tap = tap * masks[k:k + 1, :]              # zero the halo
                part = jnp.dot(w_ref[k], tap.astype(w_ref.dtype),
                               preferred_element_type=jnp.float32)
                acc = part if acc is None else acc + part
            if b_ref is not None:
                acc = acc + b_ref[...]
            return acc

        def group_norm(y, g_ref, be_ref):
            # Two-pass statistics (subtract-mean-then-square) for robustness.
            s = jnp.sum(y, axis=1, keepdims=True)              # (C, 1)
            if use_agg:
                s = jnp.dot(agg_ref[...], s, preferred_element_type=jnp.float32)
            mean = s * inv_cnt
            d = y - mean
            ss = jnp.sum(d * d, axis=1, keepdims=True)         # (C, 1)
            if use_agg:
                ss = jnp.dot(agg_ref[...], ss, preferred_element_type=jnp.float32)
            inv = jax.lax.rsqrt(ss * inv_cnt + EPS)
            scale = inv * g_ref[...]                           # fold gamma once (C,1)
            return d * scale + be_ref[...]

        h = conv3x3(x, w1_ref, b1_ref)                   # Conv2d 3x3, pad=1
        h = group_norm(h, g1_ref, be1_ref)               # GroupNorm(groups, C)
        h = jnp.maximum(h, 0.0)                          # ReLU
        h = conv3x3(h, w2_ref, b2_ref)                   # Conv2d 3x3, pad=1
        out = h + x                                      # residual add
        out = group_norm(out, g2_ref, be2_ref)
        out = jnp.maximum(out, 0.0)
        o_ref[0] = out.astype(o_ref.dtype)               # lane-dense (C, HW) store

    return kernel


def identity_block(x_nchw, params, groups=8, mxu_dtype=jnp.bfloat16):
    N, C, H, W = x_nchw.shape
    assert C % groups == 0
    HW = H * W
    # Lane-dense requirement; HW must be a multiple of 128 here.
    # TODO(synk): pad the flattened lane dim to a multiple of 128 (extend the
    # tap masks and mask pad lanes out of the GroupNorm sums) for odd spatials.
    assert HW % 128 == 0, "flattened spatial dim must be a multiple of 128"

    cg = C // groups
    use_bias = cg != 1   # cg==1: per-channel GN mean subtraction cancels the bias
    use_agg = cg != 1    # cg==1: per-channel stats need no group aggregation

    x = x_nchw.reshape(N, C, HW).astype(jnp.float32)     # free reshape, no transpose

    # PyTorch conv weight (Cout, Cin, 3, 3) -> (9, Cout, Cin), tap k = kh*3+kw,
    # stored in the MXU input dtype (bf16 by default, f32 accumulation in-kernel).
    def wtaps(w):
        return jnp.transpose(w, (2, 3, 0, 1)).reshape(9, C, C).astype(mxu_dtype)

    col = lambda v: v.reshape(C, 1).astype(jnp.float32)

    # 9 tap boundary masks: lane p = h*W + w is valid for tap (dh, dw) iff
    # (h+dh, w+dw) stays inside the image -- exactly the lanes the cyclic roll
    # wraps, so no zero-padded image copy is ever materialized in the kernel.
    hh = jnp.arange(HW) // W
    ww = jnp.arange(HW) % W
    masks = []
    for kh in range(3):
        for kw in range(3):
            dh, dw = kh - 1, kw - 1
            valid = ((hh + dh >= 0) & (hh + dh < H) &
                     (ww + dw >= 0) & (ww + dw < W))
            masks.append(valid.astype(jnp.float32))
    masks = jnp.stack(masks, axis=0)                                   # (9, HW)

    inputs = [x]
    in_specs = [pl.BlockSpec((1, C, HW), lambda n: (n, 0, 0))]

    def add_invariant(arr):
        inputs.append(arr)
        nd = arr.ndim
        in_specs.append(pl.BlockSpec(arr.shape, lambda n, _nd=nd: (0,) * _nd))

    add_invariant(wtaps(params["w1"]))
    if use_bias:
        add_invariant(col(params["b1"]))
    add_invariant(col(params["g1"]))
    add_invariant(col(params["be1"]))
    add_invariant(wtaps(params["w2"]))
    if use_bias:
        add_invariant(col(params["b2"]))
    add_invariant(col(params["g2"]))
    add_invariant(col(params["be2"]))
    if use_agg:
        ch_group = jnp.arange(C) // cg
        agg = (ch_group[:, None] == ch_group[None, :]).astype(jnp.float32)  # (C, C)
        add_invariant(agg)
    add_invariant(masks)

    # Rough per-step VMEM footprint: double-buffered x/out blocks, invariant
    # operands (also double-buffered), plus a few live f32 (C, HW) temporaries.
    # Only set an explicit limit when the conservative scoped default (16 MiB
    # on v5e) would not fit -- matters for large C * HW, esp. on v7x.
    block_bytes = C * HW * 4
    vmem_est = 4 * block_bytes
    vmem_est += 2 * sum(int(a.size) * a.dtype.itemsize for a in inputs[1:])
    vmem_est += 8 * block_bytes
    cp_kwargs = {}
    if vmem_est > 12 * 2 ** 20:
        cp_kwargs["vmem_limit_bytes"] = int(min(2 * vmem_est, 100 * 2 ** 20))

    # TODO(synk): for very large C * H*W on v7x (64 MiB VMEM), additionally tile
    # H into row bands (extra 'arbitrary' grid axis with an explicit 1-row halo);
    # the flat-HW roll halo trick is only valid on a full image.
    # TODO(synk): on single-TC v5e/v6e, fold several samples into one grid step
    # ((C, B*HW) lanes) to amortize per-step overhead; needs per-sample segment
    # sums inside GroupNorm, so kept one sample per step here (>=2 steps also
    # keeps both v7x TensorCores busy).

    kernel = _make_kernel(H, W, C, groups, use_bias, use_agg)

    out = pl.pallas_call(
        kernel,
        out_shape=jax.ShapeDtypeStruct((N, C, HW), jnp.float32),
        grid_spec=pltpu.PrefetchScalarGridSpec(
            num_scalar_prefetch=0,
            grid=(N,),
            in_specs=in_specs,
            out_specs=pl.BlockSpec((1, C, HW), lambda n: (n, 0, 0)),
        ),
        compiler_params=pltpu.CompilerParams(
            dimension_semantics=("parallel",), **cp_kwargs),
    )(*inputs)

    return out.reshape(N, C, H, W)


# ----------------------- pure-JAX reference (NCHW) -----------------------
def _ref_conv(x, w, b):
    y = jax.lax.conv_general_dilated(
        x, w, window_strides=(1, 1), padding="SAME",
        dimension_numbers=("NCHW", "OIHW", "NCHW"))
    return y + b[None, :, None, None]


def _ref_gn(x, gamma, beta, groups=8):
    N, C, H, W = x.shape
    xg = x.reshape(N, groups, -1)
    mean = xg.mean(axis=-1, keepdims=True)
    var = ((xg - mean) ** 2).mean(axis=-1, keepdims=True)
    xn = ((xg - mean) / jnp.sqrt(var + EPS)).reshape(N, C, H, W)
    return xn * gamma[None, :, None, None] + beta[None, :, None, None]


def identity_block_ref(x, p):
    h = _ref_conv(x, p["w1"], p["b1"])
    h = _ref_gn(h, p["g1"], p["be1"])
    h = jnp.maximum(h, 0.0)
    h = _ref_conv(h, p["w2"], p["b2"])
    out = h + x
    out = _ref_gn(out, p["g2"], p["be2"])
    return jnp.maximum(out, 0.0)


if __name__ == "__main__":
    N, C, H, W = 2, 8, 16, 16    # channels=8 -> GroupNorm(8, 8)
    key = jax.random.PRNGKey(0)
    ks = jax.random.split(key, 7)

    params = {
        "w1": jax.random.normal(ks[0], (C, C, 3, 3), jnp.float32) * 0.1,
        "b1": jax.random.normal(ks[1], (C,), jnp.float32) * 0.1,
        "g1": jnp.ones((C,), jnp.float32) + 0.1 * jax.random.normal(ks[2], (C,)),
        "be1": 0.1 * jax.random.normal(ks[3], (C,), jnp.float32),
        "w2": jax.random.normal(ks[4], (C, C, 3, 3), jnp.float32) * 0.1,
        "b2": jax.random.normal(ks[5], (C,), jnp.float32) * 0.1,
        "g2": jnp.ones((C,), jnp.float32),
        "be2": jnp.zeros((C,), jnp.float32),
    }

    x = jax.random.normal(ks[6], (N, C, H, W), jnp.float32)
    ref = identity_block_ref(x, params)

    # Tight check with f32 MXU inputs (validates the kernel logic exactly).
    out_f32 = jax.block_until_ready(
        identity_block(x, params, mxu_dtype=jnp.float32))
    assert out_f32.shape == (N, C, H, W)
    err_f32 = float(jnp.max(jnp.abs(out_f32 - ref)))
    assert err_f32 < 1e-3, f"f32 path mismatch vs pure-JAX reference: {err_f32}"

    # Default fast path: bf16 MXU inputs, f32 accumulation.
    out_bf16 = jax.block_until_ready(identity_block(x, params))
    err_bf16 = float(jnp.max(jnp.abs(out_bf16 - ref)))
    assert err_bf16 < 5e-2, f"bf16 path mismatch vs pure-JAX reference: {err_bf16}"

    print("KERNEL_OK")
</pallas_src>

<mosaic_0001>
module attributes {stable_mosaic.version = 11 : i64} {
  func.func @kernel(%arg0: i32, %arg1: memref<1x8x256xf32, #tpu.memory_space<vmem>>, %arg2: memref<9x8x8xf32, #tpu.memory_space<vmem>>, %arg3: memref<8x1xf32, #tpu.memory_space<vmem>>, %arg4: memref<8x1xf32, #tpu.memory_space<vmem>>, %arg5: memref<9x8x8xf32, #tpu.memory_space<vmem>>, %arg6: memref<8x1xf32, #tpu.memory_space<vmem>>, %arg7: memref<8x1xf32, #tpu.memory_space<vmem>>, %arg8: memref<9x256xf32, #tpu.memory_space<vmem>>, %arg9: memref<1x8x256xf32, #tpu.memory_space<vmem>>) attributes {dimension_semantics = [#tpu.dimension_semantics<parallel>], iteration_bounds = array<i64: 2>, scalar_prefetch = 0 : i64, scratch_operands = 0 : i64, tpu.core_type = #tpu.core_type<tc>, window_params = [{transform_indices = @transform_0, window_bounds = array<i64: 1, 8, 256>}, {pipeline_mode = #tpu.pipeline_mode<synchronous>, transform_indices = @transform_1, window_bounds = array<i64: 9, 8, 8>}, {pipeline_mode = #tpu.pipeline_mode<synchronous>, transform_indices = @transform_2, window_bounds = array<i64: 8, 1>}, {pipeline_mode = #tpu.pipeline_mode<synchronous>, transform_indices = @transform_3, window_bounds = array<i64: 8, 1>}, {pipeline_mode = #tpu.pipeline_mode<synchronous>, transform_indices = @transform_4, window_bounds = array<i64: 9, 8, 8>}, {pipeline_mode = #tpu.pipeline_mode<synchronous>, transform_indices = @transform_5, window_bounds = array<i64: 8, 1>}, {pipeline_mode = #tpu.pipeline_mode<synchronous>, transform_indices = @transform_6, window_bounds = array<i64: 8, 1>}, {pipeline_mode = #tpu.pipeline_mode<synchronous>, transform_indices = @transform_7, window_bounds = array<i64: 9, 256>}, {transform_indices = @transform_8, window_bounds = array<i64: 1, 8, 256>}]} {
    %c0 = arith.constant 0 : index
    %c0_0 = arith.constant 0 : index
    %c0_1 = arith.constant 0 : index
    %0 = vector.load %arg1[%c0, %c0_0, %c0_1] : memref<1x8x256xf32, #tpu.memory_space<vmem>>, vector<1x8x256xf32>
    %1 = vector.shape_cast %0 : vector<1x8x256xf32> to vector<8x256xf32>
    %c0_2 = arith.constant 0 : index
    %c0_3 = arith.constant 0 : index
    %2 = vector.load %arg8[%c0_2, %c0_3] : memref<9x256xf32, #tpu.memory_space<vmem>>, vector<9x256xf32>
    %c17_i32 = arith.constant 17 : i32
    %3 = tpu.dynamic_rotate %1 by %c17_i32 dim 1 : vector<8x256xf32>, i32 -> vector<8x256xf32>
    %4 = vector.extract_strided_slice %2 {offsets = [0, 0], sizes = [1, 256], strides = [1, 1]} : vector<9x256xf32> to vector<1x256xf32>
    %5 = vector.broadcast %4 : vector<1x256xf32> to vector<8x256xf32>
    %6 = arith.mulf %3, %5 : vector<8x256xf32>
    %c0_4 = arith.constant 0 : index
    %c0_5 = arith.constant 0 : index
    %c0_6 = arith.constant 0 : index
    %7 = vector.load %arg2[%c0_4, %c0_5, %c0_6] : memref<9x8x8xf32, #tpu.memory_space<vmem>>, vector<1x8x8xf32>
    %8 = vector.shape_cast %7 : vector<1x8x8xf32> to vector<8x8xf32>
    %cst = arith.constant dense<0.000000e+00> : vector<8x256xf32>
    %9 = tpu.matmul %8, %6, %cst {dimension_numbers = #tpu.dot_dimension_numbers<[1], [0], [0], [1], [0, 0, 1, 1], [], []>} : vector<8x8xf32>, vector<8x256xf32>, vector<8x256xf32> -> vector<8x256xf32>
    %c16_i32 = arith.constant 16 : i32
    %10 = tpu.dynamic_rotate %1 by %c16_i32 dim 1 : vector<8x256xf32>, i32 -> vector<8x256xf32>
    %11 = vector.extract_strided_slice %2 {offsets = [1, 0], sizes = [1, 256], strides = [1, 1]} : vector<9x256xf32> to vector<1x256xf32>
    %12 = vector.broadcast %11 : vector<1x256xf32> to vector<8x256xf32>
    %13 = arith.mulf %10, %12 : vector<8x256xf32>
    %c1 = arith.constant 1 : index
    %c0_7 = arith.constant 0 : index
    %c0_8 = arith.constant 0 : index
    %14 = vector.load %arg2[%c1, %c0_7, %c0_8] : memref<9x8x8xf32, #tpu.memory_space<vmem>>, vector<1x8x8xf32>
    %15 = vector.shape_cast %14 : vector<1x8x8xf32> to vector<8x8xf32>
    %cst_9 = arith.constant dense<0.000000e+00> : vector<8x256xf32>
    %16 = tpu.matmul %15, %13, %cst_9 {dimension_numbers = #tpu.dot_dimension_numbers<[1], [0], [0], [1], [0, 0, 1, 1], [], []>} : vector<8x8xf32>, vector<8x256xf32>, vector<8x256xf32> -> vector<8x256xf32>
    %17 = arith.addf %9, %16 : vector<8x256xf32>
    %c15_i32 = arith.constant 15 : i32
    %18 = tpu.dynamic_rotate %1 by %c15_i32 dim 1 : vector<8x256xf32>, i32 -> vector<8x256xf32>
    %19 = vector.extract_strided_slice %2 {offsets = [2, 0], sizes = [1, 256], strides = [1, 1]} : vector<9x256xf32> to vector<1x256xf32>
    %20 = vector.broadcast %19 : vector<1x256xf32> to vector<8x256xf32>
    %21 = arith.mulf %18, %20 : vector<8x256xf32>
    %c2 = arith.constant 2 : index
    %c0_10 = arith.constant 0 : index
    %c0_11 = arith.constant 0 : index
    %22 = vector.load %arg2[%c2, %c0_10, %c0_11] : memref<9x8x8xf32, #tpu.memory_space<vmem>>, vector<1x8x8xf32>
    %23 = vector.shape_cast %22 : vector<1x8x8xf32> to vector<8x8xf32>
    %cst_12 = arith.constant dense<0.000000e+00> : vector<8x256xf32>
    %24 = tpu.matmul %23, %21, %cst_12 {dimension_numbers = #tpu.dot_dimension_numbers<[1], [0], [0], [1], [0, 0, 1, 1], [], []>} : vector<8x8xf32>, vector<8x256xf32>, vector<8x256xf32> -> vector<8x256xf32>
    %25 = arith.addf %17, %24 : vector<8x256xf32>
    %c1_i32 = arith.constant 1 : i32
    %26 = tpu.dynamic_rotate %1 by %c1_i32 dim 1 : vector<8x256xf32>, i32 -> vector<8x256xf32>
    %27 = vector.extract_strided_slice %2 {offsets = [3, 0], sizes = [1, 256], strides = [1, 1]} : vector<9x256xf32> to vector<1x256xf32>
    %28 = vector.broadcast %27 : vector<1x256xf32> to vector<8x256xf32>
    %29 = arith.mulf %26, %28 : vector<8x256xf32>
    %c3 = arith.constant 3 : index
    %c0_13 = arith.constant 0 : index
    %c0_14 = arith.constant 0 : index
    %30 = vector.load %arg2[%c3, %c0_13, %c0_14] : memref<9x8x8xf32, #tpu.memory_space<vmem>>, vector<1x8x8xf32>
    %31 = vector.shape_cast %30 : vector<1x8x8xf32> to vector<8x8xf32>
    %cst_15 = arith.constant dense<0.000000e+00> : vector<8x256xf32>
    %32 = tpu.matmul %31, %29, %cst_15 {dimension_numbers = #tpu.dot_dimension_numbers<[1], [0], [0], [1], [0, 0, 1, 1], [], []>} : vector<8x8xf32>, vector<8x256xf32>, vector<8x256xf32> -> vector<8x256xf32>
    %33 = arith.addf %25, %32 : vector<8x256xf32>
    %c4 = arith.constant 4 : index
    %c0_16 = arith.constant 0 : index
    %c0_17 = arith.constant 0 : index
    %34 = vector.load %arg2[%c4, %c0_16, %c0_17] : memref<9x8x8xf32, #tpu.memory_space<vmem>>, vector<1x8x8xf32>
    %35 = vector.shape_cast %34 : vector<1x8x8xf32> to vector<8x8xf32>
    %cst_18 = arith.constant dense<0.000000e+00> : vector<8x256xf32>
    %36 = tpu.matmul %35, %1, %cst_18 {dimension_numbers = #tpu.dot_dimension_numbers<[1], [0], [0], [1], [0, 0, 1, 1], [], []>} : vector<8x8xf32>, vector<8x256xf32>, vector<8x256xf32> -> vector<8x256xf32>
    %37 = arith.addf %33, %36 : vector<8x256xf32>
    %c255_i32 = arith.constant 255 : i32
    %38 = tpu.dynamic_rotate %1 by %c255_i32 dim 1 : vector<8x256xf32>, i32 -> vector<8x256xf32>
    %39 = vector.extract_strided_slice %2 {offsets = [5, 0], sizes = [1, 256], strides = [1, 1]} : vector<9x256xf32> to vector<1x256xf32>
    %40 = vector.broadcast %39 : vector<1x256xf32> to vector<8x256xf32>
    %41 = arith.mulf %38, %40 : vector<8x256xf32>
    %c5 = arith.constant 5 : index
    %c0_19 = arith.constant 0 : index
    %c0_20 = arith.constant 0 : index
    %42 = vector.load %arg2[%c5, %c0_19, %c0_20] : memref<9x8x8xf32, #tpu.memory_space<vmem>>, vector<1x8x8xf32>
    %43 = vector.shape_cast %42 : vector<1x8x8xf32> to vector<8x8xf32>
    %cst_21 = arith.constant dense<0.000000e+00> : vector<8x256xf32>
    %44 = tpu.matmul %43, %41, %cst_21 {dimension_numbers = #tpu.dot_dimension_numbers<[1], [0], [0], [1], [0, 0, 1, 1], [], []>} : vector<8x8xf32>, vector<8x256xf32>, vector<8x256xf32> -> vector<8x256xf32>
    %45 = arith.addf %37, %44 : vector<8x256xf32>
    %c241_i32 = arith.constant 241 : i32
    %46 = tpu.dynamic_rotate %1 by %c241_i32 dim 1 : vector<8x256xf32>, i32 -> vector<8x256xf32>
    %47 = vector.extract_strided_slice %2 {offsets = [6, 0], sizes = [1, 256], strides = [1, 1]} : vector<9x256xf32> to vector<1x256xf32>
    %48 = vector.broadcast %47 : vector<1x256xf32> to vector<8x256xf32>
    %49 = arith.mulf %46, %48 : vector<8x256xf32>
    %c6 = arith.constant 6 : index
    %c0_22 = arith.constant 0 : index
    %c0_23 = arith.constant 0 : index
    %50 = vector.load %arg2[%c6, %c0_22, %c0_23] : memref<9x8x8xf32, #tpu.memory_space<vmem>>, vector<1x8x8xf32>
    %51 = vector.shape_cast %50 : vector<1x8x8xf32> to vector<8x8xf32>
    %cst_24 = arith.constant dense<0.000000e+00> : vector<8x256xf32>
    %52 = tpu.matmul %51, %49, %cst_24 {dimension_numbers = #tpu.dot_dimension_numbers<[1], [0], [0], [1], [0, 0, 1, 1], [], []>} : vector<8x8xf32>, vector<8x256xf32>, vector<8x256xf32> -> vector<8x256xf32>
    %53 = arith.addf %45, %52 : vector<8x256xf32>
    %c240_i32 = arith.constant 240 : i32
    %54 = tpu.dynamic_rotate %1 by %c240_i32 dim 1 : vector<8x256xf32>, i32 -> vector<8x256xf32>
    %55 = vector.extract_strided_slice %2 {offsets = [7, 0], sizes = [1, 256], strides = [1, 1]} : vector<9x256xf32> to vector<1x256xf32>
    %56 = vector.broadcast %55 : vector<1x256xf32> to vector<8x256xf32>
    %57 = arith.mulf %54, %56 : vector<8x256xf32>
    %c7 = arith.constant 7 : index
    %c0_25 = arith.constant 0 : index
    %c0_26 = arith.constant 0 : index
    %58 = vector.load %arg2[%c7, %c0_25, %c0_26] : memref<9x8x8xf32, #tpu.memory_space<vmem>>, vector<1x8x8xf32>
    %59 = vector.shape_cast %58 : vector<1x8x8xf32> to vector<8x8xf32>
    %cst_27 = arith.constant dense<0.000000e+00> : vector<8x256xf32>
    %60 = tpu.matmul %59, %57, %cst_27 {dimension_numbers = #tpu.dot_dimension_numbers<[1], [0], [0], [1], [0, 0, 1, 1], [], []>} : vector<8x8xf32>, vector<8x256xf32>, vector<8x256xf32> -> vector<8x256xf32>
    %61 = arith.addf %53, %60 : vector<8x256xf32>
    %c239_i32 = arith.constant 239 : i32
    %62 = tpu.dynamic_rotate %1 by %c239_i32 dim 1 : vector<8x256xf32>, i32 -> vector<8x256xf32>
    %63 = vector.extract_strided_slice %2 {offsets = [8, 0], sizes = [1, 256], strides = [1, 1]} : vector<9x256xf32> to vector<1x256xf32>
    %64 = vector.broadcast %63 : vector<1x256xf32> to vector<8x256xf32>
    %65 = arith.mulf %62, %64 : vector<8x256xf32>
    %c8 = arith.constant 8 : index
    %c0_28 = arith.constant 0 : index
    %c0_29 = arith.constant 0 : index
    %66 = vector.load %arg2[%c8, %c0_28, %c0_29] : memref<9x8x8xf32, #tpu.memory_space<vmem>>, vector<1x8x8xf32>
    %67 = vector.shape_cast %66 : vector<1x8x8xf32> to vector<8x8xf32>
    %cst_30 = arith.constant dense<0.000000e+00> : vector<8x256xf32>
    %68 = tpu.matmul %67, %65, %cst_30 {dimension_numbers = #tpu.dot_dimension_numbers<[1], [0], [0], [1], [0, 0, 1, 1], [], []>} : vector<8x8xf32>, vector<8x256xf32>, vector<8x256xf32> -> vector<8x256xf32>
    %69 = arith.addf %61, %68 : vector<8x256xf32>
    %cst_31 = arith.constant dense<0.000000e+00> : vector<8xf32>
    %70 = vector.multi_reduction <add>, %69, %cst_31 [1] : vector<8x256xf32> to vector<8xf32>
    %71 = vector.shape_cast %70 : vector<8xf32> to vector<8x1xf32>
    %cst_32 = arith.constant 3.906250e-03 : f32
    %72 = vector.broadcast %cst_32 : f32 to vector<8x1xf32>
    %73 = arith.mulf %71, %72 : vector<8x1xf32>
    %74 = vector.broadcast %73 : vector<8x1xf32> to vector<8x256xf32>
    %75 = arith.subf %69, %74 : vector<8x256xf32>
    %76 = arith.mulf %75, %75 : vector<8x256xf32>
    %cst_33 = arith.constant dense<0.000000e+00> : vector<8xf32>
    %77 = vector.multi_reduction <add>, %76, %cst_33 [1] : vector<8x256xf32> to vector<8xf32>
    %78 = vector.shape_cast %77 : vector<8xf32> to vector<8x1xf32>
    %cst_34 = arith.constant 3.906250e-03 : f32
    %79 = vector.broadcast %cst_34 : f32 to vector<8x1xf32>
    %80 = arith.mulf %78, %79 : vector<8x1xf32>
    %cst_35 = arith.constant 9.99999974E-6 : f32
    %81 = vector.broadcast %cst_35 : f32 to vector<8x1xf32>
    %82 = arith.addf %80, %81 : vector<8x1xf32>
    %83 = math.rsqrt %82 : vector<8x1xf32>
    %c0_36 = arith.constant 0 : index
    %c0_37 = arith.constant 0 : index
    %84 = vector.load %arg3[%c0_36, %c0_37] : memref<8x1xf32, #tpu.memory_space<vmem>>, vector<8x1xf32>
    %85 = arith.mulf %83, %84 : vector<8x1xf32>
    %86 = vector.broadcast %85 : vector<8x1xf32> to vector<8x256xf32>
    %87 = arith.mulf %75, %86 : vector<8x256xf32>
    %c0_38 = arith.constant 0 : index
    %c0_39 = arith.constant 0 : index
    %88 = vector.load %arg4[%c0_38, %c0_39] : memref<8x1xf32, #tpu.memory_space<vmem>>, vector<8x1xf32>
    %89 = vector.broadcast %88 : vector<8x1xf32> to vector<8x256xf32>
    %90 = arith.addf %87, %89 : vector<8x256xf32>
    %cst_40 = arith.constant 0.000000e+00 : f32
    %91 = vector.broadcast %cst_40 : f32 to vector<8x256xf32>
    %92 = arith.maximumf %90, %91 : vector<8x256xf32>
    %c17_i32_41 = arith.constant 17 : i32
    %93 = tpu.dynamic_rotate %92 by %c17_i32_41 dim 1 : vector<8x256xf32>, i32 -> vector<8x256xf32>
    %94 = vector.extract_strided_slice %2 {offsets = [0, 0], sizes = [1, 256], strides = [1, 1]} : vector<9x256xf32> to vector<1x256xf32>
    %95 = vector.broadcast %94 : vector<1x256xf32> to vector<8x256xf32>
    %96 = arith.mulf %93, %95 : vector<8x256xf32>
    %c0_42 = arith.constant 0 : index
    %c0_43 = arith.constant 0 : index
    %c0_44 = arith.constant 0 : index
    %97 = vector.load %arg5[%c0_42, %c0_43, %c0_44] : memref<9x8x8xf32, #tpu.memory_space<vmem>>, vector<1x8x8xf32>
    %98 = vector.shape_cast %97 : vector<1x8x8xf32> to vector<8x8xf32>
    %cst_45 = arith.constant dense<0.000000e+00> : vector<8x256xf32>
    %99 = tpu.matmul %98, %96, %cst_45 {dimension_numbers = #tpu.dot_dimension_numbers<[1], [0], [0], [1], [0, 0, 1, 1], [], []>} : vector<8x8xf32>, vector<8x256xf32>, vector<8x256xf32> -> vector<8x256xf32>
    %c16_i32_46 = arith.constant 16 : i32
    %100 = tpu.dynamic_rotate %92 by %c16_i32_46 dim 1 : vector<8x256xf32>, i32 -> vector<8x256xf32>
    %101 = vector.extract_strided_slice %2 {offsets = [1, 0], sizes = [1, 256], strides = [1, 1]} : vector<9x256xf32> to vector<1x256xf32>
    %102 = vector.broadcast %101 : vector<1x256xf32> to vector<8x256xf32>
    %103 = arith.mulf %100, %102 : vector<8x256xf32>
    %c1_47 = arith.constant 1 : index
    %c0_48 = arith.constant 0 : index
    %c0_49 = arith.constant 0 : index
    %104 = vector.load %arg5[%c1_47, %c0_48, %c0_49] : memref<9x8x8xf32, #tpu.memory_space<vmem>>, vector<1x8x8xf32>
    %105 = vector.shape_cast %104 : vector<1x8x8xf32> to vector<8x8xf32>
    %cst_50 = arith.constant dense<0.000000e+00> : vector<8x256xf32>
    %106 = tpu.matmul %105, %103, %cst_50 {dimension_numbers = #tpu.dot_dimension_numbers<[1], [0], [0], [1], [0, 0, 1, 1], [], []>} : vector<8x8xf32>, vector<8x256xf32>, vector<8x256xf32> -> vector<8x256xf32>
    %107 = arith.addf %99, %106 : vector<8x256xf32>
    %c15_i32_51 = arith.constant 15 : i32
    %108 = tpu.dynamic_rotate %92 by %c15_i32_51 dim 1 : vector<8x256xf32>, i32 -> vector<8x256xf32>
    %109 = vector.extract_strided_slice %2 {offsets = [2, 0], sizes = [1, 256], strides = [1, 1]} : vector<9x256xf32> to vector<1x256xf32>
    %110 = vector.broadcast %109 : vector<1x256xf32> to vector<8x256xf32>
    %111 = arith.mulf %108, %110 : vector<8x256xf32>
    %c2_52 = arith.constant 2 : index
    %c0_53 = arith.constant 0 : index
    %c0_54 = arith.constant 0 : index
    %112 = vector.load %arg5[%c2_52, %c0_53, %c0_54] : memref<9x8x8xf32, #tpu.memory_space<vmem>>, vector<1x8x8xf32>
    %113 = vector.shape_cast %112 : vector<1x8x8xf32> to vector<8x8xf32>
    %cst_55 = arith.constant dense<0.000000e+00> : vector<8x256xf32>
    %114 = tpu.matmul %113, %111, %cst_55 {dimension_numbers = #tpu.dot_dimension_numbers<[1], [0], [0], [1], [0, 0, 1, 1], [], []>} : vector<8x8xf32>, vector<8x256xf32>, vector<8x256xf32> -> vector<8x256xf32>
    %115 = arith.addf %107, %114 : vector<8x256xf32>
    %c1_i32_56 = arith.constant 1 : i32
    %116 = tpu.dynamic_rotate %92 by %c1_i32_56 dim 1 : vector<8x256xf32>, i32 -> vector<8x256xf32>
    %117 = vector.extract_strided_slice %2 {offsets = [3, 0], sizes = [1, 256], strides = [1, 1]} : vector<9x256xf32> to vector<1x256xf32>
    %118 = vector.broadcast %117 : vector<1x256xf32> to vector<8x256xf32>
    %119 = arith.mulf %116, %118 : vector<8x256xf32>
    %c3_57 = arith.constant 3 : index
    %c0_58 = arith.constant 0 : index
    %c0_59 = arith.constant 0 : index
    %120 = vector.load %arg5[%c3_57, %c0_58, %c0_59] : memref<9x8x8xf32, #tpu.memory_space<vmem>>, vector<1x8x8xf32>
    %121 = vector.shape_cast %120 : vector<1x8x8xf32> to vector<8x8xf32>
    %cst_60 = arith.constant dense<0.000000e+00> : vector<8x256xf32>
    %122 = tpu.matmul %121, %119, %cst_60 {dimension_numbers = #tpu.dot_dimension_numbers<[1], [0], [0], [1], [0, 0, 1, 1], [], []>} : vector<8x8xf32>, vector<8x256xf32>, vector<8x256xf32> -> vector<8x256xf32>
    %123 = arith.addf %115, %122 : vector<8x256xf32>
    %c4_61 = arith.constant 4 : index
    %c0_62 = arith.constant 0 : index
    %c0_63 = arith.constant 0 : index
    %124 = vector.load %arg5[%c4_61, %c0_62, %c0_63] : memref<9x8x8xf32, #tpu.memory_space<vmem>>, vector<1x8x8xf32>
    %125 = vector.shape_cast %124 : vector<1x8x8xf32> to vector<8x8xf32>
    %cst_64 = arith.constant dense<0.000000e+00> : vector<8x256xf32>
    %126 = tpu.matmul %125, %92, %cst_64 {dimension_numbers = #tpu.dot_dimension_numbers<[1], [0], [0], [1], [0, 0, 1, 1], [], []>} : vector<8x8xf32>, vector<8x256xf32>, vector<8x256xf32> -> vector<8x256xf32>
    %127 = arith.addf %123, %126 : vector<8x256xf32>
    %c255_i32_65 = arith.constant 255 : i32
    %128 = tpu.dynamic_rotate %92 by %c255_i32_65 dim 1 : vector<8x256xf32>, i32 -> vector<8x256xf32>
    %129 = vector.extract_strided_slice %2 {offsets = [5, 0], sizes = [1, 256], strides = [1, 1]} : vector<9x256xf32> to vector<1x256xf32>
    %130 = vector.broadcast %129 : vector<1x256xf32> to vector<8x256xf32>
    %131 = arith.mulf %128, %130 : vector<8x256xf32>
    %c5_66 = arith.constant 5 : index
    %c0_67 = arith.constant 0 : index
    %c0_68 = arith.constant 0 : index
    %132 = vector.load %arg5[%c5_66, %c0_67, %c0_68] : memref<9x8x8xf32, #tpu.memory_space<vmem>>, vector<1x8x8xf32>
    %133 = vector.shape_cast %132 : vector<1x8x8xf32> to vector<8x8xf32>
    %cst_69 = arith.constant dense<0.000000e+00> : vector<8x256xf32>
    %134 = tpu.matmul %133, %131, %cst_69 {dimension_numbers = #tpu.dot_dimension_numbers<[1], [0], [0], [1], [0, 0, 1, 1], [], []>} : vector<8x8xf32>, vector<8x256xf32>, vector<8x256xf32> -> vector<8x256xf32>
    %135 = arith.addf %127, %134 : vector<8x256xf32>
    %c241_i32_70 = arith.constant 241 : i32
    %136 = tpu.dynamic_rotate %92 by %c241_i32_70 dim 1 : vector<8x256xf32>, i32 -> vector<8x256xf32>
    %137 = vector.extract_strided_slice %2 {offsets = [6, 0], sizes = [1, 256], strides = [1, 1]} : vector<9x256xf32> to vector<1x256xf32>
    %138 = vector.broadcast %137 : vector<1x256xf32> to vector<8x256xf32>
    %139 = arith.mulf %136, %138 : vector<8x256xf32>
    %c6_71 = arith.constant 6 : index
    %c0_72 = arith.constant 0 : index
    %c0_73 = arith.constant 0 : index
    %140 = vector.load %arg5[%c6_71, %c0_72, %c0_73] : memref<9x8x8xf32, #tpu.memory_space<vmem>>, vector<1x8x8xf32>
    %141 = vector.shape_cast %140 : vector<1x8x8xf32> to vector<8x8xf32>
    %cst_74 = arith.constant dense<0.000000e+00> : vector<8x256xf32>
    %142 = tpu.matmul %141, %139, %cst_74 {dimension_numbers = #tpu.dot_dimension_numbers<[1], [0], [0], [1], [0, 0, 1, 1], [], []>} : vector<8x8xf32>, vector<8x256xf32>, vector<8x256xf32> -> vector<8x256xf32>
    %143 = arith.addf %135, %142 : vector<8x256xf32>
    %c240_i32_75 = arith.constant 240 : i32
    %144 = tpu.dynamic_rotate %92 by %c240_i32_75 dim 1 : vector<8x256xf32>, i32 -> vector<8x256xf32>
    %145 = vector.extract_strided_slice %2 {offsets = [7, 0], sizes = [1, 256], strides = [1, 1]} : vector<9x256xf32> to vector<1x256xf32>
    %146 = vector.broadcast %145 : vector<1x256xf32> to vector<8x256xf32>
    %147 = arith.mulf %144, %146 : vector<8x256xf32>
    %c7_76 = arith.constant 7 : index
    %c0_77 = arith.constant 0 : index
    %c0_78 = arith.constant 0 : index
    %148 = vector.load %arg5[%c7_76, %c0_77, %c0_78] : memref<9x8x8xf32, #tpu.memory_space<vmem>>, vector<1x8x8xf32>
    %149 = vector.shape_cast %148 : vector<1x8x8xf32> to vector<8x8xf32>
    %cst_79 = arith.constant dense<0.000000e+00> : vector<8x256xf32>
    %150 = tpu.matmul %149, %147, %cst_79 {dimension_numbers = #tpu.dot_dimension_numbers<[1], [0], [0], [1], [0, 0, 1, 1], [], []>} : vector<8x8xf32>, vector<8x256xf32>, vector<8x256xf32> -> vector<8x256xf32>
    %151 = arith.addf %143, %150 : vector<8x256xf32>
    %c239_i32_80 = arith.constant 239 : i32
    %152 = tpu.dynamic_rotate %92 by %c239_i32_80 dim 1 : vector<8x256xf32>, i32 -> vector<8x256xf32>
    %153 = vector.extract_strided_slice %2 {offsets = [8, 0], sizes = [1, 256], strides = [1, 1]} : vector<9x256xf32> to vector<1x256xf32>
    %154 = vector.broadcast %153 : vector<1x256xf32> to vector<8x256xf32>
    %155 = arith.mulf %152, %154 : vector<8x256xf32>
    %c8_81 = arith.constant 8 : index
    %c0_82 = arith.constant 0 : index
    %c0_83 = arith.constant 0 : index
    %156 = vector.load %arg5[%c8_81, %c0_82, %c0_83] : memref<9x8x8xf32, #tpu.memory_space<vmem>>, vector<1x8x8xf32>
    %157 = vector.shape_cast %156 : vector<1x8x8xf32> to vector<8x8xf32>
    %cst_84 = arith.constant dense<0.000000e+00> : vector<8x256xf32>
    %158 = tpu.matmul %157, %155, %cst_84 {dimension_numbers = #tpu.dot_dimension_numbers<[1], [0], [0], [1], [0, 0, 1, 1], [], []>} : vector<8x8xf32>, vector<8x256xf32>, vector<8x256xf32> -> vector<8x256xf32>
    %159 = arith.addf %151, %158 : vector<8x256xf32>
    %160 = arith.addf %159, %1 : vector<8x256xf32>
    %cst_85 = arith.constant dense<0.000000e+00> : vector<8xf32>
    %161 = vector.multi_reduction <add>, %160, %cst_85 [1] : vector<8x256xf32> to vector<8xf32>
    %162 = vector.shape_cast %161 : vector<8xf32> to vector<8x1xf32>
    %cst_86 = arith.constant 3.906250e-03 : f32
    %163 = vector.broadcast %cst_86 : f32 to vector<8x1xf32>
    %164 = arith.mulf %162, %163 : vector<8x1xf32>
    %165 = vector.broadcast %164 : vector<8x1xf32> to vector<8x256xf32>
    %166 = arith.subf %160, %165 : vector<8x256xf32>
    %167 = arith.mulf %166, %166 : vector<8x256xf32>
    %cst_87 = arith.constant dense<0.000000e+00> : vector<8xf32>
    %168 = vector.multi_reduction <add>, %167, %cst_87 [1] : vector<8x256xf32> to vector<8xf32>
    %169 = vector.shape_cast %168 : vector<8xf32> to vector<8x1xf32>
    %cst_88 = arith.constant 3.906250e-03 : f32
    %170 = vector.broadcast %cst_88 : f32 to vector<8x1xf32>
    %171 = arith.mulf %169, %170 : vector<8x1xf32>
    %cst_89 = arith.constant 9.99999974E-6 : f32
    %172 = vector.broadcast %cst_89 : f32 to vector<8x1xf32>
    %173 = arith.addf %171, %172 : vector<8x1xf32>
    %174 = math.rsqrt %173 : vector<8x1xf32>
    %c0_90 = arith.constant 0 : index
    %c0_91 = arith.constant 0 : index
    %175 = vector.load %arg6[%c0_90, %c0_91] : memref<8x1xf32, #tpu.memory_space<vmem>>, vector<8x1xf32>
    %176 = arith.mulf %174, %175 : vector<8x1xf32>
    %177 = vector.broadcast %176 : vector<8x1xf32> to vector<8x256xf32>
    %178 = arith.mulf %166, %177 : vector<8x256xf32>
    %c0_92 = arith.constant 0 : index
    %c0_93 = arith.constant 0 : index
    %179 = vector.load %arg7[%c0_92, %c0_93] : memref<8x1xf32, #tpu.memory_space<vmem>>, vector<8x1xf32>
    %180 = vector.broadcast %179 : vector<8x1xf32> to vector<8x256xf32>
    %181 = arith.addf %178, %180 : vector<8x256xf32>
    %cst_94 = arith.constant 0.000000e+00 : f32
    %182 = vector.broadcast %cst_94 : f32 to vector<8x256xf32>
    %183 = arith.maximumf %181, %182 : vector<8x256xf32>
    %c0_95 = arith.constant 0 : index
    %c0_96 = arith.constant 0 : index
    %c0_97 = arith.constant 0 : index
    %184 = vector.load %arg9[%c0_95, %c0_96, %c0_97] : memref<1x8x256xf32, #tpu.memory_space<vmem>>, vector<1x8x256xf32>
    %185 = vector.shape_cast %184 : vector<1x8x256xf32> to vector<8x256xf32>
    %186 = vector.shape_cast %183 : vector<8x256xf32> to vector<1x8x256xf32>
    tpu.vector_store %arg9[%c0_95, %c0_96, %c0_97], %186 {strides = array<i32>} : memref<1x8x256xf32, #tpu.memory_space<vmem>>, vector<1x8x256xf32>,
    return
  }
  func.func @transform_0(%arg0: i32) -> (i32, i32, i32) {
    %c0_i32 = arith.constant 0 : i32
    %c0_i32_0 = arith.constant 0 : i32
    %c0_i32_1 = arith.constant 0 : i32
    return %arg0, %c0_i32, %c0_i32_0 : i32, i32, i32
  }
  func.func @transform_1(%arg0: i32) -> (i32, i32, i32) {
    %c0_i32 = arith.constant 0 : i32
    %c0_i32_0 = arith.constant 0 : i32
    %c0_i32_1 = arith.constant 0 : i32
    %c0_i32_2 = arith.constant 0 : i32
    return %c0_i32, %c0_i32_0, %c0_i32_1 : i32, i32, i32
  }
  func.func @transform_2(%arg0: i32) -> (i32, i32) {
    %c0_i32 = arith.constant 0 : i32
    %c0_i32_0 = arith.constant 0 : i32
    %c0_i32_1 = arith.constant 0 : i32
    return %c0_i32, %c0_i32_0 : i32, i32
  }
  func.func @transform_3(%arg0: i32) -> (i32, i32) {
    %c0_i32 = arith.constant 0 : i32
    %c0_i32_0 = arith.constant 0 : i32
    %c0_i32_1 = arith.constant 0 : i32
    return %c0_i32, %c0_i32_0 : i32, i32
  }
  func.func @transform_4(%arg0: i32) -> (i32, i32, i32) {
    %c0_i32 = arith.constant 0 : i32
    %c0_i32_0 = arith.constant 0 : i32
    %c0_i32_1 = arith.constant 0 : i32
    %c0_i32_2 = arith.constant 0 : i32
    return %c0_i32, %c0_i32_0, %c0_i32_1 : i32, i32, i32
  }
  func.func @transform_5(%arg0: i32) -> (i32, i32) {
    %c0_i32 = arith.constant 0 : i32
    %c0_i32_0 = arith.constant 0 : i32
    %c0_i32_1 = arith.constant 0 : i32
    return %c0_i32, %c0_i32_0 : i32, i32
  }
  func.func @transform_6(%arg0: i32) -> (i32, i32) {
    %c0_i32 = arith.constant 0 : i32
    %c0_i32_0 = arith.constant 0 : i32
    %c0_i32_1 = arith.constant 0 : i32
    return %c0_i32, %c0_i32_0 : i32, i32
  }
  func.func @transform_7(%arg0: i32) -> (i32, i32) {
    %c0_i32 = arith.constant 0 : i32
    %c0_i32_0 = arith.constant 0 : i32
    %c0_i32_1 = arith.constant 0 : i32
    return %c0_i32, %c0_i32_0 : i32, i32
  }
  func.func @transform_8(%arg0: i32) -> (i32, i32, i32) {
    %c0_i32 = arith.constant 0 : i32
    %c0_i32_0 = arith.constant 0 : i32
    %c0_i32_1 = arith.constant 0 : i32
    return %arg0, %c0_i32, %c0_i32_0 : i32, i32, i32
  }
}

</mosaic_0001>

<bundles_post_ra>
// kernel: tpu_custom_call.1
= control target key start
LH: loop header
LB: loop body
LE: loop exit
PB: predicated region body
PF: predicated region fallthrough
CT: control target
= control target key end

     0   :  { %13 = vsyncpa [#allocation3], 0  ;;  %s2115_s0 = inlined_call_operand.vmem [shape: f32[2,8,256], index: 0, kind: input, shape index: {}]   ;;  %s2116_s1 = inlined_call_operand.vmem [shape: f32[9,8,8], index: 1, kind: input, shape index: {}]   ;;  %s2117_s2 = inlined_call_operand.vmem [shape: f32[8,1], index: 2, kind: input, shape index: {}]   ;;  %s2118_s3 = inlined_call_operand.vmem [shape: f32[8,1], index: 3, kind: input, shape index: {}]   ;;  %s2119_s4 = inlined_call_operand.vmem [shape: f32[9,8,8], index: 4, kind: input, shape index: {}]   ;;  %s2120_s5 = inlined_call_operand.vmem [shape: f32[8,1], index: 5, kind: input, shape index: {}]   ;;  %s2121_s6 = inlined_call_operand.vmem [shape: f32[8,1], index: 6, kind: input, shape index: {}]   ;;  %s2122_s7 = inlined_call_operand.vmem [shape: f32[9,256], index: 7, kind: input, shape index: {}]   ;;  %s2123_s8 = inlined_call_operand.hbm [shape: f32[2,8,256], index: 8, kind: output, shape index: {}]  }
   0x1   :  { %15 = vsyncpa [#allocation3 + $0x1], 0  ;;  %s1704_s27 = smov 0   ;;  %s1706_s28 = smov 0  }
   0x2   :  { %s1708_s29 = smov 0   ;;  %s1710_s30 = smov 0  }
   0x3 LB: > { %s1725_s9 = sadd.s32 4294967295, %s1648_s30   ;;  %s1465_s10 = sadd.s32 4294967294, %s1648_s30   ;;  %s1648_s30 = sphi %s1710_s30, %s2132_s30   ;;  %s1644_s29 = sphi %s1708_s29, %s2131_s29   ;;  %s1640_s28 = sphi %s1706_s28, %s2130_s28   ;;  %s1636_s27 = sphi %s1704_s27, %s2129_s27  }
   0x4   : > { %s1729_s11 = sadd.s32 1, %s1648_s30   ;;  %s201_s12 = sadd.s32 1, %s1644_s29 }
   0x5   : > { %s198_s13 = ssub.s32 %s1648_s30, %s1729_s11  ;;  %p211_p0 = scmp.ne.s32.totalorder %s1644_s29, %s1640_s28 }
   0x6   : > { %p199_p1 = scmp.eq.s32.totalorder %s198_s13, 0  ;;  %p212_p2 = scmp.eq.s32.totalorder %s1725_s9, 1 }
   0x7   : > { %p217_p3 = scmp.ne.s32.totalorder %s1640_s28, %s1636_s27  ;;  %p218_p4 = scmp.eq.s32.totalorder %s1465_s10, 1 }
   0x8   : > { %s1740_s14 = scalar_select %p199_p1, %s1644_s29, %s201_s12  }
   0x9   : > { %p1742_p5 = por %p212_p2, %p211_p0  ;;  %p1746_p6 = por %p218_p4, %p217_p3 }
   0xa   : > { %p1468_p7 = scmp.ge.s32.totalorder %s1648_s30, 1  ;;  %p265_p8 = scmp.lt.s32.totalorder %s1648_s30, 3 }
   0xc   : > { %p266_p9 = pnand %p1468_p7, %p265_p8 }
   0xd   : > { %p299_p10 = scmp.lt.s32.totalorder (!%p266_p9), %s1725_s9, 1  ;;  %s1650_s22 = smov (!%p266_p9), 16  }
   0xe   : > { %269 = sbr.rel (%p266_p9) target bundleno = 1411 (0x583), region = 52  ;;  %s1651_s23 = smov (!%p266_p9), 17  }
   0xf   : > { %s1652_s24 = smov (!%p266_p9), 15   ;;  %s1653_s25 = smov (!%p266_p9), 1  }
  0x10   : > { %s1654_s26 = smov (!%p266_p9), 127   ;;  %s1655_s10 = smov (!%p266_p9), 113  }
  0x11   : > { %s1656_s12 = smov (!%p266_p9), 112   ;;  %s2124_s13 = smov (!%p266_p9), 111  }
  0x12   : > { %s1530_s19 = sshll.u32 (!%p266_p9), %s1725_s9, 4 }
  0x13   : > { %s300_s17 = scalar_select %p299_p10, %s1725_s9, 1  ;;  %v314_v3 = vlaneseq  ;;  %v1798_v8 = vld [vmem:[%s2122_s7] sm:$0xff]  ;;  %v1803_v9 = vld [vmem:[%s2122_s7 + $0x8] sm:$0xff]  ;;  %vm337_vm3 = vcmask 64512   ;;  %v1477_v41 = vld [vmem:[%s2116_s1 + $0x10] sm:$0xff] }
  0x14   : > { %v331_v10 = vperm.slane %v1798_v8, 1  ;;  %v332_v11 = vperm.slane %v1803_v9, 1  ;;  %v319_v12 = vperm.slane %v1798_v8, 0  ;;  %v320_v13 = vperm.slane %v1803_v9, 0  ;;  %v1472_v28 = vld [vmem:[%s2116_s1 + $0x8] sm:$0xff]  ;;  %v323_v29 = vld [vmem:[%s2116_s1] sm:$0xff] }
  0x15   : > { %s1529_s18 = sshll.u32 %s300_s17, 4  ;;  %v1793_v6 = vand.u32 127, %v314_v3  ;;  %v431_v18 = vperm.slane %v1798_v8, 2  ;;  %v432_v19 = vperm.slane %v1803_v9, 2  ;;  %v489_v33 = vperm.slane %v1798_v8, 3  ;;  %v1480_v42 = vld [vmem:[%s2116_s1 + $0x18] sm:$0xff] }
  0x16   : > { %s303_s21 = scalar_lea.vmem %s2115_s0, %s1529_s18  ;;  %v490_v34 = vperm.slane %v1803_v9, 3  ;;  %v652_v43 = vperm.slane %v1798_v8, 6  ;;  %v653_v45 = vperm.slane %v1803_v9, 6  ;;  %v594_v46 = vperm.slane %v1798_v8, 5  ;;  %v1483_v58 = vld [vmem:[%s2116_s1 + $0x20] sm:$0xff]  ;;  %v1486_v59 = vld [vmem:[%s2116_s1 + $0x28] sm:$0xff] }
  0x17   : > { %v1757_v0 = vld [vmem:[%s303_s21] sm:$0xff]  ;;  %v1765_v1 = vld [vmem:[%s303_s21 + $0x8] sm:$0xff]  ;;  %vm428_vm0 = vcmp.lt.s32.totalorder %v1793_v6, 15  ;;  %vm328_vm1 = vcmp.lt.s32.totalorder %v1793_v6, 16  ;;  %vm316_vm2 = vcmp.lt.s32.totalorder %v1793_v6, 17  ;;  %vm486_vm4 = vcmp.lt.s32.totalorder %v1793_v6, 1 }
  0x18   : > { %324 = vrot.lane.b32.xlu1 %v1757_v0, %s1650_s22  ;;  %310 = vrot.lane.b32.xlu0 %v1757_v0, %s1651_s23  ;;  %vm649_vm5 = vcmp.lt.s32.totalorder %v1793_v6, 113  ;;  %vm591_vm6 = vcmp.lt.s32.totalorder %v1793_v6, 127  ;;  %v595_v47 = vperm.slane %v1803_v9, 5  ;;  %vm707_vm7 = vcmp.lt.s32.totalorder %v1793_v6, 112  ;;  %s296_s17 = sand.u32 1, %s1640_s28  }
  0x19   : > { %424 = vrot.lane.b32.xlu2 %v1757_v0, %s1652_s24  ;;  %v710_v60 = vperm.slane %v1798_v8, 7  ;;  %v711_v61 = vperm.slane %v1803_v9, 7  ;;  %vm765_vm8 = vcmp.lt.s32.totalorder %v1793_v6, 111  ;;  %s1469_s18 = sshll.u32 %s296_s17, 4  ;;  %s1390_s9 = scalar_lea.sflag [#allocation3], %s296_s17 }
  0x20   : > { %326 = vrot.lane.b32.xlu1 %v1765_v1, %s1650_s22  ;;  %312 = vrot.lane.b32.xlu0 %v1765_v1, %s1651_s23 }
  0x21   : > { %426 = vrot.lane.b32.xlu2 %v1765_v1, %s1652_s24 }
  0x28   : > { %484 = vrot.lane.b32.xlu1 %v1765_v1, %s1653_s25  ;;  %482 = vrot.lane.b32.xlu0 %v1757_v0, %s1653_s25 }
  0x29   : > { %587 = vrot.lane.b32.xlu2 %v1757_v0, %s1654_s26 }
  0x30   : > { %645 = vrot.lane.b32.xlu1 %v1757_v0, %s1655_s10  ;;  %589 = vrot.lane.b32.xlu0 %v1765_v1, %s1654_s26 }
  0x31   : > { %647 = vrot.lane.b32.xlu2 %v1765_v1, %s1655_s10 }
  0x38   : > { %705 = vrot.lane.b32.xlu1 %v1765_v1, %s1656_s12  ;;  %703 = vrot.lane.b32.xlu0 %v1757_v0, %s1656_s12 }
  0x39   : > { %761 = vrot.lane.b32.xlu2 %v1757_v0, %s2124_s13 }
  0x40   : > { %763 = vrot.lane.b32.xlu0 %v1765_v1, %s2124_s13  ;;  %s2128_s13 = smov 111  }
  0x73   : > { %v425_v2 = vpop.permute.xlu2 %424 }
  0x7b   : > { %v427_v7 = vpop.permute.xlu2 %426 }
  0x7c   : > { %v429_v14 = vsel %vm428_vm0, %v425_v2, %v427_v7  ;;  %v430_v15 = vsel %vm428_vm0, %v427_v7, %v425_v2  ;;  %v1489_v7 = vld [vmem:[%s2116_s1 + $0x30] sm:$0xff] }
  0x7d   : > { %v433_v30 = vmul.f32 %v431_v18, %v430_v15  ;;  %v434_v31 = vmul.f32 %v432_v19, %v429_v14  ;;  %v1492_v14 = vld [vmem:[%s2116_s1 + $0x38] sm:$0xff] }
  0x83   : > { %v588_v32 = vpop.permute.xlu2 %587 }
  0x8a   : > { %v325_v4 = vpop.permute.xlu1 %324  ;;  %v311_v5 = vpop.permute.xlu0 %310 }
  0x8b   : > { %v648_v44 = vpop.permute.xlu2 %647 }
  0x92   : > { %v327_v16 = vpop.permute.xlu1 %326  ;;  %v313_v17 = vpop.permute.xlu0 %312 }
  0x93   : > { %v330_v20 = vsel %vm328_vm1, %v327_v16, %v325_v4  ;;  %v329_v21 = vsel %vm328_vm1, %v325_v4, %v327_v16  ;;  %v318_v22 = vsel %vm316_vm2, %v313_v17, %v311_v5  ;;  %v317_v23 = vsel %vm316_vm2, %v311_v5, %v313_v17  ;;  %v762_v15 = vpop.permute.xlu2 %761  ;;  %v1926_v16 = vld [vmem:[%s2122_s7 + $0x10] ss:$0 sm:$0xff]  ;;  %v1931_v17 = vld [vmem:[%s2122_s7 + $0x18] ss:$0 sm:$0xff] }
  0x94   : > { %v333_v24 = vmul.f32 %v331_v10, %v330_v20  ;;  %v334_v25 = vmul.f32 %v332_v11, %v329_v21  ;;  %v321_v26 = vmul.f32 %v319_v12, %v318_v22  ;;  %v322_v27 = vmul.f32 %v320_v13, %v317_v23 }
  0x96   : > { %356 = vmatpush.msra.mxu0 %v333_v24  ;;  %376 = vmatpush.msra.mxu1 %v334_v25  ;;  %v1495_v25 = vld [vmem:[%s2116_s1 + $0x40] sm:$0xff] }
  0x97   : > { %399 = vmatpush.msra.mxu2 %v321_v26  ;;  %419 = vmatpush.msra.mxu3 %v322_v27 }
  0x98   : > { %1473 = vmatmul.msk.f32.vlgmr.msra.gmra.mxu0 %vm337_vm3, %v1472_v28  ;;  %1474 = vmatmul.msk.f32.vlgmr.msra.gmra.mxu1 %vm337_vm3, %v1472_v28 }
  0x99   : > { %1475 = vmatmul.msk.f32.vlgmr.msra.gmra.mxu2 %vm337_vm3, %v323_v29  ;;  %1476 = vmatmul.msk.f32.vlgmr.msra.gmra.mxu3 %vm337_vm3, %v323_v29 }
  0x9a   : > { %455 = vmatpush.msrb.mxu0 %v433_v30  ;;  %475 = vmatpush.msrb.mxu1 %v434_v31  ;;  %v485_v35 = vpop.permute.xlu1 %484  ;;  %v483_v36 = vpop.permute.xlu0 %482 }
  0x9b   : > { %v487_v37 = vsel %vm486_vm4, %v483_v36, %v485_v35  ;;  %v488_v38 = vsel %vm486_vm4, %v485_v35, %v483_v36 }
  0x9c   : > { %560 = vmatpush.msra.mxu0 %v1757_v0  ;;  %580 = vmatpush.msra.mxu1 %v1765_v1  ;;  %v491_v39 = vmul.f32 %v489_v33, %v488_v38  ;;  %v492_v40 = vmul.f32 %v490_v34, %v487_v37 }
  0x9e   : > { %513 = vmatpush.msrb.mxu2 %v491_v39  ;;  %533 = vmatpush.msrb.mxu3 %v492_v40 }
  0xa0   : > { %1478 = vmatmul.msk.f32.vlgmr.msrb.gmra.mxu0 %vm337_vm3, %v1477_v41  ;;  %1479 = vmatmul.msk.f32.vlgmr.msrb.gmra.mxu1 %vm337_vm3, %v1477_v41 }
  0xa1   : > { %1481 = vmatmul.msk.f32.vlgmr.msrb.gmra.mxu2 %vm337_vm3, %v1480_v42  ;;  %1482 = vmatmul.msk.f32.vlgmr.msrb.gmra.mxu3 %vm337_vm3, %v1480_v42 }
  0xa2   : > { %v646_v48 = vpop.permute.xlu1 %645  ;;  %v590_v49 = vpop.permute.xlu0 %589 }
  0xa3   : > { %v650_v50 = vsel %vm649_vm5, %v646_v48, %v648_v44  ;;  %v651_v51 = vsel %vm649_vm5, %v648_v44, %v646_v48  ;;  %v592_v52 = vsel %vm591_vm6, %v588_v32, %v590_v49  ;;  %v593_v53 = vsel %vm591_vm6, %v590_v49, %v588_v32 }
  0xa4   : > { %v654_v54 = vmul.f32 %v652_v43, %v650_v50  ;;  %v655_v55 = vmul.f32 %v653_v45, %v651_v51  ;;  %v596_v56 = vmul.f32 %v594_v46, %v592_v52  ;;  %v597_v57 = vmul.f32 %v595_v47, %v593_v53 }
  0xa6   : > { %618 = vmatpush.msra.mxu2 %v596_v56  ;;  %638 = vmatpush.msra.mxu3 %v597_v57 }
  0xa7   : > { %676 = vmatpush.msrb.mxu0 %v654_v54  ;;  %696 = vmatpush.msrb.mxu1 %v655_v55 }
  0xa8   : > { %1484 = vmatmul.msk.f32.vlgmr.msra.gmra.mxu0 %vm337_vm3, %v1483_v58  ;;  %1485 = vmatmul.msk.f32.vlgmr.msra.gmra.mxu1 %vm337_vm3, %v1483_v58 }
  0xa9   : > { %1487 = vmatmul.msk.f32.vlgmr.msra.gmra.mxu2 %vm337_vm3, %v1486_v59  ;;  %1488 = vmatmul.msk.f32.vlgmr.msra.gmra.mxu3 %vm337_vm3, %v1486_v59 }
  0xaa   : > { %v706_v62 = vpop.permute.xlu1 %705  ;;  %v704_v63 = vpop.permute.xlu0 %703 }
  0xab   : > { %v708_v2 = vsel %vm707_vm7, %v704_v63, %v706_v62  ;;  %v709_v3 = vsel %vm707_vm7, %v706_v62, %v704_v63 }
  0xac   : > { %v712_v4 = vmul.f32 %v710_v60, %v708_v2  ;;  %v713_v5 = vmul.f32 %v711_v61, %v709_v3 }
  0xae   : > { %734 = vmatpush.msrb.mxu2 %v712_v4  ;;  %754 = vmatpush.msrb.mxu3 %v713_v5 }
  0xb0   : > { %1490 = vmatmul.msk.f32.vlgmr.msrb.gmra.mxu0 %vm337_vm3, %v1489_v7  ;;  %1491 = vmatmul.msk.f32.vlgmr.msrb.gmra.mxu1 %vm337_vm3, %v1489_v7 }
  0xb1   : > { %1493 = vmatmul.msk.f32.vlgmr.msrb.gmra.mxu2 %vm337_vm3, %v1492_v14  ;;  %1494 = vmatmul.msk.f32.vlgmr.msrb.gmra.mxu3 %vm337_vm3, %v1492_v14 }
  0xb2   : > { %v764_v20 = vpop.permute.xlu0 %763 }
  0xb3   : > { %v766_v21 = vsel %vm765_vm8, %v762_v15, %v764_v20  ;;  %v767_v22 = vsel %vm765_vm8, %v764_v20, %v762_v15 }
  0xb4   : > { %v770_v23 = vmul.f32 %v1926_v16, %v766_v21  ;;  %v771_v24 = vmul.f32 %v1931_v17, %v767_v22 }
  0xb6   : > { %792 = vmatpush.msra.mxu0 %v770_v23  ;;  %812 = vmatpush.msra.mxu1 %v771_v24 }
  0xb8   : > { %1496 = vmatmul.msk.f32.vlgmr.msra.gmra.mxu0 %vm337_vm3, %v1495_v25  ;;  %1497 = vmatmul.msk.f32.vlgmr.msra.gmra.mxu1 %vm337_vm3, %v1495_v25  ;;  %v1658_v25 = vmov 0  }
  0xb9   : > { %1579 = vset.pattern.permute.xlu0 %v1658_v25 }
 0x115   : > { %v358_v26 = vpop.f32.mrf.mxu0  ;;  %v378_v27 = vpop.f32.mrf.mxu1 }
 0x11c   : > { %v401_v28 = vpop.f32.mrf.mxu2  ;;  %v421_v29 = vpop.f32.mrf.mxu3 }
 0x11d   : > { %v457_v30 = vpop.f32.mrf.mxu0  ;;  %v477_v31 = vpop.f32.mrf.mxu1  ;;  %v402_v32 = vadd.f32 %v401_v28, %v358_v26  ;;  %v422_v35 = vadd.f32 %v421_v29, %v378_v27 }
 0x11f   : > { %v480_v40 = vadd.f32 %v457_v30, %v402_v32  ;;  %v481_v41 = vadd.f32 %v477_v31, %v422_v35 }
 0x124   : > { %v515_v36 = vpop.f32.mrf.mxu2  ;;  %v535_v37 = vpop.f32.mrf.mxu3 }
 0x125   : > { %v562_v38 = vpop.f32.mrf.mxu0  ;;  %v582_v39 = vpop.f32.mrf.mxu1  ;;  %v538_v42 = vadd.f32 %v515_v36, %v480_v40  ;;  %v539_v44 = vadd.f32 %v535_v37, %v481_v41  ;;  %v842_v37 = vld [vmem:[%s2117_s2] sm:$0xff] }
 0x126   : > { %v851_v40 = vld [vmem:[%s2118_s3] sm:$0xff] }
 0x127   : > { %v585_v50 = vadd.f32 %v562_v38, %v538_v42  ;;  %v586_v51 = vadd.f32 %v582_v39, %v539_v44 }
 0x12c   : > { %v620_v48 = vpop.f32.mrf.mxu2  ;;  %v640_v49 = vpop.f32.mrf.mxu3 }
 0x12d   : > { %v678_v52 = vpop.f32.mrf.mxu0  ;;  %v698_v53 = vpop.f32.mrf.mxu1  ;;  %v643_v54 = vadd.f32 %v620_v48, %v585_v50  ;;  %v644_v55 = vadd.f32 %v640_v49, %v586_v51 }
 0x12f   : > { %v701_v56 = vadd.f32 %v678_v52, %v643_v54  ;;  %v702_v57 = vadd.f32 %v698_v53, %v644_v55 }
 0x134   : > { %v736_v58 = vpop.f32.mrf.mxu2  ;;  %v756_v59 = vpop.f32.mrf.mxu3 }
 0x135   : > { %v759_v62 = vadd.f32 %v736_v58, %v701_v56  ;;  %v760_v63 = vadd.f32 %v756_v59, %v702_v57  ;;  %v794_v2 = vpop.f32.mrf.mxu0  ;;  %v814_v3 = vpop.f32.mrf.mxu1 }
 0x137   : > { %v817_v4 = vadd.f32 %v794_v2, %v759_v62  ;;  %v818_v5 = vadd.f32 %v814_v3, %v760_v63 }
 0x139   : > { %v819_v7 = vadd.f32 %v818_v5, %v817_v4 }
 0x13b   : > { %820 = vadd.xlane.f32.xlu1 %v819_v7 }
 0x1ae   : > { %v821_v14 = vpop.xlane.xlu1 %820 }
 0x1af   : > { %v822_v15 = vmul.f32 0.00390625, %v821_v14 }
 0x1b1   : > { %v823_v20 = vsub.f32 %v817_v4, %v822_v15  ;;  %v824_v21 = vsub.f32 %v818_v5, %v822_v15  ;;  %v1498_v5 = vld [vmem:[%s2119_s4 + $0x8] sm:$0xff] }
 0x1b3   : > { %v825_v22 = vmul.f32 %v823_v20, %v823_v20  ;;  %v826_v23 = vmul.f32 %v824_v21, %v824_v21 }
 0x1b5   : > { %v827_v24 = vadd.f32 %v826_v23, %v825_v22  ;;  %v869_v22 = vld [vmem:[%s2119_s4] sm:$0xff] }
 0x1b6   : > { %v1509_v23 = vld [vmem:[%s2119_s4 + $0x20] sm:$0xff] }
 0x1b7   : > { %828 = vadd.xlane.f32.xlu2 %v827_v24 }
 0x22a   : > { %v829_v26 = vpop.xlane.xlu2 %828 }
 0x22b   : > { %v830_v27 = vmul.f32 0.00390625, %v829_v26 }
 0x22d   : > { %v831_v28 = vadd.f32 1e-05, %v830_v27 }
 0x22f   : > { %1582 = vrsqrt.f32 %v831_v28  ;;  %vm838_vm10 = vweird.f32 %v831_v28 }
 0x235   : > { %v1583_v29 = vpop.eup %1582 }
 0x236   : > { %v833_v30 = vmul.f32 %v1583_v29, %v831_v28  ;;  %vm839_vm9 = vweird.f32 %v1583_v29 }
 0x237   : > { %vm840_vm11 = vmor %vm838_vm10, %vm839_vm9 }
 0x238   : > { %v834_v31 = vmul.f32 %v1583_v29, %v833_v30 }
 0x23a   : > { %v835_v32 = vmul.f32 0.5, %v834_v31 }
 0x23c   : > { %v836_v35 = vsub.f32 1.5, %v835_v32 }
 0x23e   : > { %v837_v36 = vmul.f32 %v1583_v29, %v836_v35  ;;  %v1506_v35 = vld [vmem:[%s2119_s4 + $0x18] sm:$0xff] }
 0x240   : > { %v841_v38 = vsel %vm840_vm11, %v1583_v29, %v837_v36 }
 0x241   : > { %v843_v39 = vmul.f32 %v842_v37, %v841_v38  ;;  %v1515_v37 = vld [vmem:[%s2119_s4 + $0x30] sm:$0xff]  ;;  %v1512_v38 = vld [vmem:[%s2119_s4 + $0x28] sm:$0xff] }
 0x243   : > { %846 = vperm.xlu0 %1579, %v843_v39  }
 0x24b   : > { %854 = vperm.xlu0 %1579, %v851_v40  }
 0x2b5   : > { %v847_v41 = vpop.permute.xlu0 %846 }
 0x2b6   : > { %v849_v42 = vmul.f32 %v847_v41, %v823_v20  ;;  %v850_v44 = vmul.f32 %v847_v41, %v824_v21 }
 0x2bd   : > { %v855_v48 = vpop.permute.xlu0 %854 }
 0x2be   : > { %v857_v49 = vadd.f32 %v855_v48, %v849_v42  ;;  %v858_v50 = vadd.f32 %v855_v48, %v850_v44  ;;  %v1521_v44 = vld [vmem:[%s2119_s4 + $0x40] sm:$0xff] }
 0x2c0   : > { %v859_v51 = vmax.f32 %v857_v49, 0.0  ;;  %v860_v52 = vmax.f32 %v858_v50, 0.0 }
 0x2c2   : > { %968 = vrot.lane.b32.xlu1 %v860_v52, %s1652_s24  ;;  %966 = vrot.lane.b32.xlu2 %v859_v51, %s1652_s24  ;;  %s298_s24 = scalar_lea.vmem [#allocation2], %s1469_s18  ;;  %s1606_s18 = scalar_lea.hbm %s2123_s8, 32 }
 0x2c3   : > { %870 = vrot.lane.b32.xlu0 %v859_v51, %s1650_s22 }
 0x2ca   : > { %1178 = vrot.lane.b32.xlu1 %v859_v51, %s1655_s10  ;;  %1023 = vrot.lane.b32.xlu2 %v860_v52, %s1653_s25 }
 0x2cb   : > { %872 = vrot.lane.b32.xlu0 %v860_v52, %s1650_s22 }
 0x2d2   : > { %1125 = vrot.lane.b32.xlu1 %v860_v52, %s1654_s26  ;;  %1123 = vrot.lane.b32.xlu2 %v859_v51, %s1654_s26 }
 0x2d3   : > { %861 = vrot.lane.b32.xlu0 %v859_v51, %s1651_s23 }
 0x2da   : > { %1233 = vrot.lane.b32.xlu1 %v859_v51, %s1656_s12  ;;  %1290 = vrot.lane.b32.xlu2 %v860_v52, %s2128_s13 }
 0x2db   : > { %863 = vrot.lane.b32.xlu0 %v860_v52, %s1651_s23  ;;  %s1401_s23 = scalar_lea.hbm %s2123_s8, %s1530_s19 }
 0x2dc   : > { %s1405_s26 = sshll.u32 %s1401_s23, 4  ;;  %s1406_s26 = int_to_ptr.hbm [resolvable:$true] %s1405_s26 }
 0x2e3   : > { %1021 = vrot.lane.b32.xlu0 %v859_v51, %s1653_s25  ;;  %s1403_s25 = sshll.u32 %s298_s24, 4  ;;  %s1404_s25 = int_to_ptr.vmem [resolvable:$true] %s1403_s25 }
 0x2eb   : > { %1180 = vrot.lane.b32.xlu0 %v860_v52, %s1655_s10  ;;  %s1600_s10 = sshra.s32 %s1406_s26, 4  ;;  %s1601_s10 = int_to_ptr.hbm [resolvable:$true] %s1600_s10 }
 0x2ec   : > { %p1607_p0 = scmp.lt.s32.totalorder %s1601_s10, %s2123_s8 }
 0x2f3   : > { %1288 = vrot.lane.b32.xlu0 %v859_v51, %s2128_s13 }
 0x2fb   : > { %1235 = vrot.lane.b32.xlu0 %v860_v52, %s1656_s12  ;;  %s1602_s12 = scalar_lea.hbm %s1601_s10, 16 }
 0x2fc   : > { %p1603_p11 = scmp.ne.s32.totalorder %s1601_s10, %s1602_s12  ;;  %p1608_p1 = scmp.lt.s32.totalorder %s1606_s18, %s1602_s12 }
 0x2fe   : > { %p1604_p12 = pnand %p1603_p11, %p1742_p5  ;;  %p1609_p2 = por %p1608_p1, %p1607_p0 }
 0x300   : > { %p1605_p13 = pneg %p1604_p12 }
 0x302   : > { %p1610_p3 = pnand %p1609_p2, %p1605_p13 }
 0x31c   : > { %v967_v55 = vpop.permute.xlu2 %966 }
 0x334   : > { %v969_v54 = vpop.permute.xlu1 %968 }
 0x335   : > { %v871_v53 = vpop.permute.xlu0 %870  ;;  %v970_v56 = vsel %vm428_vm0, %v967_v55, %v969_v54  ;;  %v971_v57 = vsel %vm428_vm0, %v969_v54, %v967_v55 }
 0x336   : > { %v972_v3 = vmul.f32 %v971_v57, %v431_v18  ;;  %v973_v4 = vmul.f32 %v970_v56, %v432_v19  ;;  %v1503_v18 = vld [vmem:[%s2119_s4 + $0x10] sm:$0xff]  ;;  %v1024_v19 = vpop.permute.xlu2 %1023 }
 0x33d   : > { %v873_v58 = vpop.permute.xlu0 %872 }
 0x33e   : > { %v874_v59 = vsel %vm328_vm1, %v871_v53, %v873_v58  ;;  %v875_v62 = vsel %vm328_vm1, %v873_v58, %v871_v53 }
 0x33f   : > { %v876_v63 = vmul.f32 %v875_v62, %v331_v10  ;;  %v877_v2 = vmul.f32 %v874_v59, %v332_v11  ;;  %v1179_v11 = vpop.permute.xlu1 %1178 }
 0x341   : > { %898 = vmatpush.msra.mxu2 %v876_v63  ;;  %918 = vmatpush.msra.mxu3 %v877_v2 }
 0x342   : > { %1499 = vmatmul.msk.f32.vlgmr.msra.gmra.mxu2 %vm337_vm3, %v1498_v5  ;;  %1500 = vmatmul.msk.f32.vlgmr.msra.gmra.mxu3 %vm337_vm3, %v1498_v5 }
 0x343   : > { %994 = vmatpush.msrb.mxu2 %v972_v3  ;;  %1014 = vmatpush.msrb.mxu3 %v973_v4 }
 0x345   : > { %1096 = vmatpush.msra.mxu2 %v859_v51  ;;  %1116 = vmatpush.msra.mxu3 %v860_v52  ;;  %v862_v10 = vpop.permute.xlu0 %861  ;;  %v1518_v52 = vld [vmem:[%s2119_s4 + $0x38] sm:$0xff] }
 0x347   : > { %v1126_v24 = vpop.permute.xlu1 %1125 }
 0x34a   : > { %1504 = vmatmul.msk.f32.vlgmr.msrb.gmra.mxu2 %vm337_vm3, %v1503_v18  ;;  %1505 = vmatmul.msk.f32.vlgmr.msrb.gmra.mxu3 %vm337_vm3, %v1503_v18 }
 0x34d   : > { %v864_v7 = vpop.permute.xlu0 %863 }
 0x34e   : > { %v865_v14 = vsel %vm316_vm2, %v862_v10, %v864_v7  ;;  %v866_v15 = vsel %vm316_vm2, %v864_v7, %v862_v10 }
 0x34f   : > { %v867_v20 = vmul.f32 %v866_v15, %v319_v12  ;;  %v868_v21 = vmul.f32 %v865_v14, %v320_v13  ;;  %v1124_v12 = vpop.permute.xlu2 %1123  ;;  %v1234_v48 = vpop.permute.xlu1 %1233 }
 0x350   : > { %v1127_v13 = vsel %vm591_vm6, %v1124_v12, %v1126_v24  ;;  %v1128_v25 = vsel %vm591_vm6, %v1126_v24, %v1124_v12 }
 0x351   : > { %941 = vmatpush.msrb.mxu0 %v867_v20  ;;  %961 = vmatpush.msrb.mxu1 %v868_v21  ;;  %v1129_v31 = vmul.f32 %v1127_v13, %v594_v46  ;;  %v1130_v32 = vmul.f32 %v1128_v25, %v595_v47 }
 0x352   : > { %1501 = vmatmul.msk.f32.vlgmr.msrb.gmra.mxu0 %vm337_vm3, %v869_v22  ;;  %1502 = vmatmul.msk.f32.vlgmr.msrb.gmra.mxu1 %vm337_vm3, %v869_v22 }
 0x353   : > { %1510 = vmatmul.msk.f32.vlgmr.msra.gmra.mxu2 %vm337_vm3, %v1509_v23  ;;  %1511 = vmatmul.msk.f32.vlgmr.msra.gmra.mxu3 %vm337_vm3, %v1509_v23 }
 0x355   : > { %v1022_v26 = vpop.permute.xlu0 %1021 }
 0x356   : > { %v1025_v27 = vsel %vm486_vm4, %v1022_v26, %v1024_v19  ;;  %v1026_v28 = vsel %vm486_vm4, %v1024_v19, %v1022_v26 }
 0x357   : > { %v1027_v29 = vmul.f32 %v1026_v28, %v489_v33  ;;  %v1028_v30 = vmul.f32 %v1025_v27, %v490_v34 }
 0x359   : > { %1049 = vmatpush.msra.mxu0 %v1027_v29  ;;  %1069 = vmatpush.msra.mxu1 %v1028_v30 }
 0x35a   : > { %1507 = vmatmul.msk.f32.vlgmr.msra.gmra.mxu0 %vm337_vm3, %v1506_v35  ;;  %1508 = vmatmul.msk.f32.vlgmr.msra.gmra.mxu1 %vm337_vm3, %v1506_v35 }
 0x35b   : > { %1151 = vmatpush.msrb.mxu0 %v1129_v31  ;;  %1171 = vmatpush.msrb.mxu1 %v1130_v32 }
 0x35d   : > { %v1181_v33 = vpop.permute.xlu0 %1180 }
 0x35e   : > { %v1182_v34 = vsel %vm649_vm5, %v1179_v11, %v1181_v33  ;;  %v1183_v46 = vsel %vm649_vm5, %v1181_v33, %v1179_v11 }
 0x35f   : > { %v1184_v47 = vmul.f32 %v1182_v34, %v652_v43  ;;  %v1185_v36 = vmul.f32 %v1183_v46, %v653_v45  ;;  %v1291_v43 = vpop.permute.xlu2 %1290 }
 0x361   : > { %1206 = vmatpush.msrb.mxu2 %v1184_v47  ;;  %1226 = vmatpush.msrb.mxu3 %v1185_v36 }
 0x362   : > { %1516 = vmatmul.msk.f32.vlgmr.msrb.gmra.mxu2 %vm337_vm3, %v1515_v37  ;;  %1517 = vmatmul.msk.f32.vlgmr.msrb.gmra.mxu3 %vm337_vm3, %v1515_v37 }
 0x363   : > { %1513 = vmatmul.msk.f32.vlgmr.msrb.gmra.mxu0 %vm337_vm3, %v1512_v38  ;;  %1514 = vmatmul.msk.f32.vlgmr.msrb.gmra.mxu1 %vm337_vm3, %v1512_v38 }
 0x365   : > { %v1289_v45 = vpop.permute.xlu0 %1288 }
 0x366   : > { %v1292_v39 = vsel %vm765_vm8, %v1289_v45, %v1291_v43  ;;  %v1293_v40 = vsel %vm765_vm8, %v1291_v43, %v1289_v45 }
 0x367   : > { %v1294_v41 = vmul.f32 %v1926_v16, %v1292_v39  ;;  %v1295_v42 = vmul.f32 %v1931_v17, %v1293_v40  ;;  %v1368_v40 = vld [vmem:[%s2120_s5] sm:$0xff] }
 0x369   : > { %1316 = vmatpush.msra.mxu2 %v1294_v41  ;;  %1336 = vmatpush.msra.mxu3 %v1295_v42 }
 0x36a   : > { %1522 = vmatmul.msk.f32.vlgmr.msra.gmra.mxu2 %vm337_vm3, %v1521_v44  ;;  %1523 = vmatmul.msk.f32.vlgmr.msra.gmra.mxu3 %vm337_vm3, %v1521_v44  ;;  %v1377_v44 = vld [vmem:[%s2121_s6] sm:$0xff] }
 0x36d   : > { %v1236_v49 = vpop.permute.xlu0 %1235 }
 0x36e   : > { %v1237_v50 = vsel %vm707_vm7, %v1234_v48, %v1236_v49  ;;  %v1238_v16 = vsel %vm707_vm7, %v1236_v49, %v1234_v48 }
 0x36f   : > { %v1239_v17 = vmul.f32 %v1237_v50, %v710_v60  ;;  %v1240_v51 = vmul.f32 %v1238_v16, %v711_v61 }
 0x371   : > { %1261 = vmatpush.msra.mxu0 %v1239_v17  ;;  %1281 = vmatpush.msra.mxu1 %v1240_v51 }
 0x372   : > { %1519 = vmatmul.msk.f32.vlgmr.msra.gmra.mxu0 %vm337_vm3, %v1518_v52  ;;  %1520 = vmatmul.msk.f32.vlgmr.msra.gmra.mxu1 %vm337_vm3, %v1518_v52 }
 0x3c5   : > { %v900_v53 = vpop.f32.mrf.mxu2  ;;  %v920_v54 = vpop.f32.mrf.mxu3 }
 0x3cd   : > { %v996_v56 = vpop.f32.mrf.mxu2  ;;  %v1016_v8 = vpop.f32.mrf.mxu3 }
 0x3cf   : > { %v943_v6 = vpop.f32.mrf.mxu0  ;;  %v963_v55 = vpop.f32.mrf.mxu1 }
 0x3d0   : > { %v944_v58 = vadd.f32 %v943_v6, %v900_v53  ;;  %v964_v59 = vadd.f32 %v963_v55, %v920_v54 }
 0x3d2   : > { %v1019_v62 = vadd.f32 %v996_v56, %v944_v58  ;;  %v1020_v63 = vadd.f32 %v1016_v8, %v964_v59 }
 0x3d6   : > { %v1098_v9 = vpop.f32.mrf.mxu2  ;;  %v1118_v61 = vpop.f32.mrf.mxu3 }
 0x3d7   : > { %v1051_v60 = vpop.f32.mrf.mxu0  ;;  %v1071_v57 = vpop.f32.mrf.mxu1 }
 0x3d8   : > { %v1074_v2 = vadd.f32 %v1051_v60, %v1019_v62  ;;  %v1075_v3 = vadd.f32 %v1071_v57, %v1020_v63 }
 0x3da   : > { %v1121_v18 = vadd.f32 %v1098_v9, %v1074_v2  ;;  %v1122_v19 = vadd.f32 %v1118_v61, %v1075_v3 }
 0x3e0   : > { %v1153_v10 = vpop.f32.mrf.mxu0  ;;  %v1173_v11 = vpop.f32.mrf.mxu1 }
 0x3e1   : > { %v1176_v7 = vadd.f32 %v1153_v10, %v1121_v18  ;;  %v1177_v14 = vadd.f32 %v1173_v11, %v1122_v19 }
 0x3e5   : > { %v1208_v4 = vpop.f32.mrf.mxu2  ;;  %v1228_v5 = vpop.f32.mrf.mxu3 }
 0x3e6   : > { %v1231_v15 = vadd.f32 %v1208_v4, %v1176_v7  ;;  %v1232_v20 = vadd.f32 %v1228_v5, %v1177_v14 }
 0x3ed   : > { %v1318_v21 = vpop.f32.mrf.mxu2  ;;  %v1338_v22 = vpop.f32.mrf.mxu3 }
 0x3ef   : > { %v1263_v23 = vpop.f32.mrf.mxu0  ;;  %v1283_v24 = vpop.f32.mrf.mxu1 }
 0x3f0   : > { %v1286_v12 = vadd.f32 %v1263_v23, %v1231_v15  ;;  %v1287_v13 = vadd.f32 %v1283_v24, %v1232_v20 }
 0x3f2   : > { %v1341_v25 = vadd.f32 %v1318_v21, %v1286_v12  ;;  %v1342_v26 = vadd.f32 %v1338_v22, %v1287_v13 }
 0x3f4   : > { %v1343_v27 = vadd.f32 %v1341_v25, %v1757_v0  ;;  %v1344_v28 = vadd.f32 %v1342_v26, %v1765_v1 }
 0x3f6   : > { %v1345_v29 = vadd.f32 %v1344_v28, %v1343_v27 }
 0x3f8   : > { %1346 = vadd.xlane.f32.xlu2 %v1345_v29 }
 0x46b   : > { %v1347_v30 = vpop.xlane.xlu2 %1346 }
 0x46c   : > { %v1348_v31 = vmul.f32 0.00390625, %v1347_v30 }
 0x46e   : > { %v1349_v32 = vsub.f32 %v1343_v27, %v1348_v31  ;;  %v1350_v35 = vsub.f32 %v1344_v28, %v1348_v31 }
 0x470   : > { %v1351_v33 = vmul.f32 %v1349_v32, %v1349_v32  ;;  %v1352_v34 = vmul.f32 %v1350_v35, %v1350_v35 }
 0x472   : > { %v1353_v46 = vadd.f32 %v1352_v34, %v1351_v33 }
 0x474   : > { %1354 = vadd.xlane.f32.xlu1 %v1353_v46 }
 0x4e7   : > { %v1355_v47 = vpop.xlane.xlu1 %1354 }
 0x4e8   : > { %v1356_v36 = vmul.f32 0.00390625, %v1355_v47 }
 0x4ea   : > { %v1357_v37 = vadd.f32 1e-05, %v1356_v36 }
 0x4ec   : > { %1584 = vrsqrt.f32 %v1357_v37  ;;  %vm1364_vm13 = vweird.f32 %v1357_v37 }
 0x4f2   : > { %v1585_v38 = vpop.eup %1584 }
 0x4f3   : > { %v1359_v43 = vmul.f32 %v1585_v38, %v1357_v37  ;;  %vm1365_vm12 = vweird.f32 %v1585_v38 }
 0x4f4   : > { %vm1366_vm14 = vmor %vm1364_vm13, %vm1365_vm12 }
 0x4f5   : > { %v1360_v0 = vmul.f32 %v1585_v38, %v1359_v43 }
 0x4f7   : > { %v1361_v1 = vmul.f32 0.5, %v1360_v0 }
 0x4f9   : > { %v1362_v45 = vsub.f32 1.5, %v1361_v1 }
 0x4fb   : > { %v1363_v39 = vmul.f32 %v1585_v38, %v1362_v45 }
 0x4fd   : > { %v1367_v41 = vsel %vm1366_vm14, %v1585_v38, %v1363_v39 }
 0x4fe   : > { %v1369_v42 = vmul.f32 %v1368_v40, %v1367_v41 }
 0x500   : > { %1372 = vperm.xlu0 %1579, %v1369_v42  }
 0x508   : > { %1380 = vperm.xlu0 %1579, %v1377_v44  }
 0x572   : > { %v1373_v48 = vpop.permute.xlu0 %1372 }
 0x573   : > { %v1375_v49 = vmul.f32 %v1373_v48, %v1349_v32  ;;  %v1376_v50 = vmul.f32 %v1373_v48, %v1350_v35 }
 0x57a   : > { %v1381_v16 = vpop.permute.xlu0 %1380 }
 0x57b   : > { %v1383_v17 = vadd.f32 %v1381_v16, %v1375_v49  ;;  %v1384_v51 = vadd.f32 %v1381_v16, %v1376_v50 }
 0x57d   : > { %v1385_v52 = vmax.f32 %v1383_v17, 0.0  ;;  %v1386_v53 = vmax.f32 %v1384_v51, 0.0 }
 0x57f   : > { %1387 = vst [vmem:[%s298_s24] sm:$0xff] %v1385_v52 }
 0x580   : > { %1388 = vst [vmem:[%s298_s24 + $0x8] sm:$0xff] %v1386_v53 }
 0x581   : > { %1613 = shalt.err (!%p1610_p3)
}
 0x582   : > { %1531 = dma.vmem_to_hbm [thread:$0]  (%p1742_p5), %s1404_s25, 256, %s1406_s26, %s1390_s9  }
 0x583 PF: > { %p1537_p4 = scmp.ge.s32.totalorder %s1648_s30, 2  ;;  %s1417_s17 = sand.u32 1, %s1636_s27  }
 0x584   : > { %s1418_s22 = scalar_lea.sflag [#allocation3], %s1417_s17 }
 0x585   : > { %p1534_p7 = pnand %p1537_p4, %p1746_p6 }
 0x587   : > { %p1535_p8 = pneg %p1534_p7 }
 0x589   : > { %1631 = dma.done.wait (%p1535_p8), %s1418_s22, 256  }
 0x58a   : > { %1633 = vsyncadd (%p1535_p8), %s1418_s22, 4294967040  ;;  %p18_p9 = scmp.ge.s32.totalorder %s1729_s11, 4   ;;  %s2129_s27 = smov %s1640_s28 }
 0x58b   : > { %s2130_s28 = smov %s1644_s29  ;;  %s2131_s29 = smov %s1740_s14 }
 0x58c   : > { %s2132_s30 = smov %s1729_s11  ;;  %20 = sbr.rel (!%p18_p9) target bundleno = 3 (0x3), region = 103 }
 0x591   :  { %1424 = vsyncpa [#allocation3], 1 }
 0x592   :  { %1426 = vsyncpa [#allocation3 + $0x1], 1 }

</bundles_post_ra>
